<compile_context>
chip_gen: v7x
topology: tpu7x:2x2x1
jax: 0.10.0
libtpu: 0.0.40
codegen_flags: <defaults>
</compile_context>

<pallas_src>
import functools

import jax
import jax.numpy as jnp
from jax.experimental import pallas as pl
from jax.experimental.pallas import tpu as pltpu


def _vmem_capacity_bytes() -> int:
    """Physical VMEM of the current chip; conservative fallback = v7x (64 MiB)."""
    try:
        cap = int(getattr(pltpu.get_tpu_info(), "vmem_capacity_bytes", 0))
        if cap > 0:
            return cap
    except Exception:
        pass
    return 64 * 1024 * 1024


def _pick_tile_rows(rows: int, bytes_per_row: int, ws_budget: int) -> int:
    """Largest sublane-aligned row tile whose double-buffered footprint fits."""
    tile = ws_budget // max(1, 2 * bytes_per_row)   # x2: double buffering
    tile = max(8, min(tile, 2048))
    tile = (tile // 8) * 8                          # sublane-aligned
    return rows if tile >= rows else tile


# ---------------------------------------------------------------------------
# Kernels
# ---------------------------------------------------------------------------

def _add_split_kernel(base_ref, src_ref, out_ref, *, interchange_dim, id_pad,
                      need_mask):
    """Lane-aligned path: base/out are (T, D); src is the narrow (T, id_pad) slab."""
    base = base_ref[...]
    src = src_ref[...]
    if need_mask:  # only when interchange_dim is not a multiple of 128
        lane = jax.lax.broadcasted_iota(jnp.int32, src.shape, dimension=1)
        src = jnp.where(lane < interchange_dim, src, jnp.zeros_like(src))
    out_ref[:, :id_pad] = base[:, :id_pad] + src
    d = out_ref.shape[1]
    if id_pad < d:  # static branch: pass-through for untouched lanes
        out_ref[:, id_pad:] = base[:, id_pad:]


def _add_masked_kernel(base_ref, src_ref, out_ref, *, interchange_dim, lane_mod):
    """Generic / lane-dense small-D path: masked elementwise add."""
    lane = jax.lax.broadcasted_iota(jnp.int32, out_ref.shape, dimension=1)
    if lane_mod is not None:
        # lane % lane_mod, lane_mod guaranteed power of two on this path.
        lane = jnp.bitwise_and(lane, lane_mod - 1)
    src = src_ref[...]
    out_ref[...] = base_ref[...] + jnp.where(lane < interchange_dim, src,
                                             jnp.zeros_like(src))


# ---------------------------------------------------------------------------
# Wrapper
# ---------------------------------------------------------------------------

def addition_intervention(base, source, interchange_dim):
    """base, source: (..., D). Returns base with source added on [..., :interchange_dim]."""
    assert base.shape == source.shape, "base/source shape mismatch"
    orig_shape = base.shape
    D = int(orig_shape[-1])
    rows = 1
    for s in orig_shape[:-1]:
        rows *= int(s)

    interchange_dim = int(interchange_dim)
    if interchange_dim <= 0:
        return base
    interchange_dim = min(interchange_dim, D)

    itemsize = jnp.dtype(base.dtype).itemsize
    vmem_cap = _vmem_capacity_bytes()
    ws_budget = vmem_cap // 3            # target for double-buffered working set
    vmem_limit = (vmem_cap * 3) // 4     # 48 MiB on v7x, 96 MiB on v5e/v6e

    base2d = base.reshape(rows, D)
    src2d = source.reshape(rows, D)
    cparams = pltpu.CompilerParams(
        dimension_semantics=("parallel",),
        vmem_limit_bytes=vmem_limit,
    )

    if D % 128 == 0:
        # --- lane-aligned path: DMA only the needed lanes of `source` --------
        id_pad = min(D, ((interchange_dim + 127) // 128) * 128)
        need_mask = (interchange_dim % 128) != 0
        src_narrow = src2d[:, :id_pad]   # 128-aligned slice -> lane-dense, cheap

        bytes_per_row = (2 * D + id_pad) * itemsize   # base in + out + narrow src
        tile_r = _pick_tile_rows(rows, bytes_per_row, ws_budget)

        kernel = functools.partial(
            _add_split_kernel,
            interchange_dim=interchange_dim, id_pad=id_pad, need_mask=need_mask)

        out2d = pl.pallas_call(
            kernel,
            out_shape=jax.ShapeDtypeStruct((rows, D), base.dtype),
            grid_spec=pltpu.PrefetchScalarGridSpec(
                num_scalar_prefetch=0,
                grid=(pl.cdiv(rows, tile_r),),
                in_specs=[
                    pl.BlockSpec((tile_r, D), lambda i: (i, 0)),
                    pl.BlockSpec((tile_r, id_pad), lambda i: (i, 0)),
                ],
                out_specs=pl.BlockSpec((tile_r, D), lambda i: (i, 0)),
            ),
            compiler_params=cparams,
        )(base2d, src_narrow)
        return out2d.reshape(orig_shape)

    if D < 128 and 128 % D == 0 and (rows * D) % 128 == 0:
        # --- small-D path: re-lay-out to a lane-dense (rows*D/128, 128) view --
        rows_ld = (rows * D) // 128
        base_ld = base2d.reshape(rows_ld, 128)
        src_ld = src2d.reshape(rows_ld, 128)

        bytes_per_row = 3 * 128 * itemsize
        tile_r = _pick_tile_rows(rows_ld, bytes_per_row, ws_budget)

        kernel = functools.partial(
            _add_masked_kernel, interchange_dim=interchange_dim, lane_mod=D)

        out_ld = pl.pallas_call(
            kernel,
            out_shape=jax.ShapeDtypeStruct((rows_ld, 128), base.dtype),
            grid_spec=pltpu.PrefetchScalarGridSpec(
                num_scalar_prefetch=0,
                grid=(pl.cdiv(rows_ld, tile_r),),
                in_specs=[
                    pl.BlockSpec((tile_r, 128), lambda i: (i, 0)),
                    pl.BlockSpec((tile_r, 128), lambda i: (i, 0)),
                ],
                out_specs=pl.BlockSpec((tile_r, 128), lambda i: (i, 0)),
            ),
            compiler_params=cparams,
        )(base_ld, src_ld)
        return out_ld.reshape(orig_shape)

    # --- generic fallback: D not 128-divisible -> full-width blocks, row-tiled
    bytes_per_row = 3 * D * itemsize
    tile_r = _pick_tile_rows(rows, bytes_per_row, ws_budget)
    kernel = functools.partial(
        _add_masked_kernel, interchange_dim=interchange_dim, lane_mod=None)

    out2d = pl.pallas_call(
        kernel,
        out_shape=jax.ShapeDtypeStruct((rows, D), base.dtype),
        grid_spec=pltpu.PrefetchScalarGridSpec(
            num_scalar_prefetch=0,
            grid=(pl.cdiv(rows, tile_r),),
            in_specs=[
                pl.BlockSpec((tile_r, D), lambda i: (i, 0)),
                pl.BlockSpec((tile_r, D), lambda i: (i, 0)),
            ],
            out_specs=pl.BlockSpec((tile_r, D), lambda i: (i, 0)),
        ),
        compiler_params=cparams,
    )(base2d, src2d)
    return out2d.reshape(orig_shape)


if __name__ == "__main__":
    key = jax.random.PRNGKey(0)

    def _check(shape, interchange_dim, k):
        kb, ks = jax.random.split(k)
        base = jax.random.normal(kb, shape, dtype=jnp.float32)
        source = jax.random.normal(ks, shape, dtype=jnp.float32)
        out = jax.block_until_ready(
            addition_intervention(base, source, interchange_dim))
        ref = base.at[..., :interchange_dim].add(source[..., :interchange_dim])
        assert jnp.allclose(out, ref, atol=1e-6), (
            f"mismatch vs reference for shape={shape} id={interchange_dim}")

    k0, k1, k2, key = jax.random.split(key, 4)

    # Module-sized demo: batch=2, seq=8, embed_dim=32, interchange_dim=16
    # (exercises the small-D lane-dense path).
    _check((2, 8, 32), 16, k0)
    # Lane-aligned path with residual mask (interchange_dim not a 128 multiple).
    _check((2, 16, 256), 160, k1)
    # Lane-aligned path, mask-free (interchange_dim a multiple of 128).
    _check((2, 16, 256), 128, k2)

    print("KERNEL_OK")
</pallas_src>

<mosaic_0001>
module attributes {stable_mosaic.version = 11 : i64} {
  func.func @_add_masked_kernel(%arg0: i32, %arg1: memref<4x128xf32, #tpu.memory_space<vmem>>, %arg2: memref<4x128xf32, #tpu.memory_space<vmem>>, %arg3: memref<4x128xf32, #tpu.memory_space<vmem>>) attributes {dimension_semantics = [#tpu.dimension_semantics<parallel>], iteration_bounds = array<i64: 1>, scalar_prefetch = 0 : i64, scratch_operands = 0 : i64, tpu.core_type = #tpu.core_type<tc>, window_params = [{transform_indices = @transform_0, window_bounds = array<i64: 4, 128>}, {transform_indices = @transform_1, window_bounds = array<i64: 4, 128>}, {transform_indices = @transform_2, window_bounds = array<i64: 4, 128>}]} {
    %0 = tpu.iota {dimensions = array<i32: 1>} : vector<4x128xi32>
    %c31_i32 = arith.constant 31 : i32
    %1 = vector.broadcast %c31_i32 : i32 to vector<4x128xi32>
    %2 = arith.andi %0, %1 : vector<4x128xi32>
    %c0 = arith.constant 0 : index
    %c0_0 = arith.constant 0 : index
    %3 = vector.load %arg2[%c0, %c0_0] : memref<4x128xf32, #tpu.memory_space<vmem>>, vector<4x128xf32>
    %c0_1 = arith.constant 0 : index
    %c0_2 = arith.constant 0 : index
    %4 = vector.load %arg1[%c0_1, %c0_2] : memref<4x128xf32, #tpu.memory_space<vmem>>, vector<4x128xf32>
    %c16_i32 = arith.constant 16 : i32
    %5 = vector.broadcast %c16_i32 : i32 to vector<4x128xi32>
    %6 = arith.cmpi slt, %2, %5 : vector<4x128xi32>
    %cst = arith.constant 0.000000e+00 : f32
    %7 = vector.broadcast %cst : f32 to vector<4x128xf32>
    %8 = arith.select %6, %3, %7 : vector<4x128xi1>, vector<4x128xf32>
    %9 = arith.addf %4, %8 : vector<4x128xf32>
    %c0_3 = arith.constant 0 : index
    %c0_4 = arith.constant 0 : index
    %10 = vector.load %arg3[%c0_3, %c0_4] : memref<4x128xf32, #tpu.memory_space<vmem>>, vector<4x128xf32>
    tpu.vector_store %arg3[%c0_3, %c0_4], %9 {strides = array<i32>} : memref<4x128xf32, #tpu.memory_space<vmem>>, vector<4x128xf32>,
    return
  }
  func.func @transform_0(%arg0: i32) -> (i32, i32) {
    %c0_i32 = arith.constant 0 : i32
    %c0_i32_0 = arith.constant 0 : i32
    return %arg0, %c0_i32 : i32, i32
  }
  func.func @transform_1(%arg0: i32) -> (i32, i32) {
    %c0_i32 = arith.constant 0 : i32
    %c0_i32_0 = arith.constant 0 : i32
    return %arg0, %c0_i32 : i32, i32
  }
  func.func @transform_2(%arg0: i32) -> (i32, i32) {
    %c0_i32 = arith.constant 0 : i32
    %c0_i32_0 = arith.constant 0 : i32
    return %arg0, %c0_i32 : i32, i32
  }
}

</mosaic_0001>

<bundles_post_ra>
// kernel: tpu_custom_call.1
= control target key start
LH: loop header
LB: loop body
LE: loop exit
PB: predicated region body
PF: predicated region fallthrough
CT: control target
= control target key end

     0   :  { %7 = vsyncpa [#allocation3], 0  ;;  %s190_s0 = inlined_call_operand.hbm [shape: f32[4,128], index: 0, kind: input, shape index: {}]   ;;  %s191_s1 = inlined_call_operand.hbm [shape: f32[4,128], index: 1, kind: input, shape index: {}]   ;;  %s192_s2 = inlined_call_operand.hbm [shape: f32[4,128], index: 2, kind: output, shape index: {}]  }
   0x1   :  { %8 = vsyncpa [#allocation6], 0 }
   0x2   :  { %9 = vsyncpa [#allocation4], 0  ;;  %s136_s9 = smov [#allocation2]   ;;  %s137_s11 = smov [#allocation5]  }
   0x3   :  { %s16_s10 = sshll.u32 %s136_s9, 4  ;;  %s26_s12 = sshll.u32 %s137_s11, 4  ;;  %s17_s10 = int_to_ptr.vmem [resolvable:$true] %s16_s10  ;;  %s27_s12 = int_to_ptr.vmem [resolvable:$true] %s26_s12 }
   0x4   :  { %s64_s15 = scalar_lea.hbm %s190_s0, 64 }
   0x5   :  { %p65_p0 = scmp.ne.s32.totalorder %s190_s0, %s64_s15  ;;  %p68_p1 = scmp.lt.u32.totalorder %s64_s15, %s190_s0 }
   0x7   :  { %p70_p2 = pnand %p68_p1, %p65_p0 }
   0x9   :  { %73 = shalt.err (!%p70_p2)
}
   0xa   :  { %s74_s20 = scalar_lea.vmem %s17_s10, 64  ;;  %p79_p4 = scmp.lt.s32.totalorder %s17_s10, %s17_s10 }
   0xb   :  { %p75_p3 = scmp.ne.s32.totalorder %s17_s10, %s74_s20  ;;  %p80_p5 = scmp.lt.s32.totalorder %s74_s20, %s74_s20 }
   0xd   :  { %p81_p6 = por %p80_p5, %p79_p4 }
   0xf   :  { %p82_p7 = pnand %p81_p6, %p75_p3 }
  0x11   :  { %85 = shalt.err (!%p82_p7)
}
  0x12   :  { %19 = dma.hbm_to_vmem [thread:$0]  %s190_s0, 64, %s17_s10, [#allocation3]  }
  0x13   :  { %s86_s25 = scalar_lea.hbm %s191_s1, 64 }
  0x14   :  { %p87_p8 = scmp.ne.s32.totalorder %s191_s1, %s86_s25  ;;  %p90_p9 = scmp.lt.u32.totalorder %s86_s25, %s191_s1 }
  0x16   :  { %p92_p10 = pnand %p90_p9, %p87_p8 }
  0x18   :  { %95 = shalt.err (!%p92_p10)
}
  0x19   :  { %s96_s30 = scalar_lea.vmem %s27_s12, 64  ;;  %p101_p12 = scmp.lt.s32.totalorder %s27_s12, %s27_s12 }
  0x1a   :  { %p97_p11 = scmp.ne.s32.totalorder %s27_s12, %s96_s30  ;;  %p102_p13 = scmp.lt.s32.totalorder %s96_s30, %s96_s30 }
  0x1c   :  { %p103_p0 = por %p102_p13, %p101_p12 }
  0x1e   :  { %p104_p1 = pnand %p103_p0, %p97_p11 }
  0x20   :  { %107 = shalt.err (!%p104_p1)
}
  0x21   :  { %29 = dma.hbm_to_vmem [thread:$0]  %s191_s1, 64, %s27_s12, [#allocation6]  }
  0x22   :  { %130 = dma.done.wait [#allocation3], 64  }
  0x23   :  { %131 = vsyncadd [#allocation3], 4294967232 }
  0x24   :  { %132 = dma.done.wait [#allocation6], 64  }
  0x25   :  { %133 = vsyncadd [#allocation6], 4294967232  ;;  %v36_v0 = vlaneseq  ;;  %s138_s4 = smov [#allocation7]   ;;  %v39_v3 = vld [vmem:[#allocation5] sm:$0xf] }
  0x26   :  { %s51_s5 = sshll.u32 %s138_s4, 4  ;;  %v40_v4 = vld [vmem:[#allocation2] sm:$0xf]  ;;  %s52_s5 = int_to_ptr.vmem [resolvable:$true] %s51_s5 }
  0x27   :  { %v37_v1 = vand.u32 127, %v36_v0  ;;  %s108_s6 = scalar_lea.vmem %s52_s5, 64  ;;  %p113_p3 = scmp.lt.s32.totalorder %s52_s5, %s52_s5 }
  0x28   :  { %p109_p2 = scmp.ne.s32.totalorder %s52_s5, %s108_s6  ;;  %p114_p4 = scmp.lt.s32.totalorder %s108_s6, %s108_s6 }
  0x29   :  { %v38_v2 = vand.u32 31, %v37_v1 }
  0x2a   :  { %p115_p5 = por %p114_p4, %p113_p3 }
  0x2b   :  { %vm41_vm0 = vcmp.lt.s32.totalorder %v38_v2, 16 }
  0x2c   :  { %v42_v5 = vsel %vm41_vm0, %v39_v3, 0.0  ;;  %p116_p6 = pnand %p115_p5, %p109_p2 }
  0x2d   :  { %v43_v6 = vadd.f32 %v42_v5, %v40_v4 }
  0x2f   :  { %44 = vst [vmem:[#allocation7] sm:$0xf] %v43_v6 }
  0x30   :  { %119 = shalt.err (!%p116_p6)
}
  0x31   :  { %s120_s8 = scalar_lea.hbm %s192_s2, 64 }
  0x32   :  { %p121_p7 = scmp.ne.s32.totalorder %s192_s2, %s120_s8  ;;  %p124_p8 = scmp.lt.u32.totalorder %s120_s8, %s192_s2 }
  0x34   :  { %p126_p9 = pnand %p124_p8, %p121_p7 }
  0x36   :  { %129 = shalt.err (!%p126_p9)
}
  0x37   :  { %54 = dma.vmem_to_hbm [thread:$0]  %s52_s5, 64, %s192_s2, [#allocation4]  }
  0x38   :  { %134 = dma.done.wait [#allocation4], 64  }
  0x39   :  { %135 = vsyncadd [#allocation4], 4294967232 }
  0x3a   :  { %58 = vsyncpa [#allocation3], 1 }
  0x3b   :  { %59 = vsyncpa [#allocation6], 1 }
  0x3c   :  { %60 = vsyncpa [#allocation4], 1 }

</bundles_post_ra>
